<compile_context>
chip_gen: v6e
topology: v6e:2x2x1
jax: 0.10.0
libtpu: 0.0.40
codegen_flags: <defaults>
</compile_context>

<pallas_src>
import functools

import jax
import jax.numpy as jnp
from jax import lax
from jax.experimental import pallas as pl
from jax.experimental.pallas import tpu as pltpu

IN_DIM, H1_DIM, H2_DIM, OUT_DIM = 6, 64, 64, 2
TILE_B = 65536   # batch lanes per grid step (multiple of CHUNK); ~2 MiB HBM per step (f32)
CHUNK = 256      # lanes per inner-loop chunk; (64, 256) f32 intermediates ~= 16 vregs


def _round_up(n, m):
    return ((n + m - 1) // m) * m


def _mlp_kernel(x_ref, w1_ref, b1_ref, w2_ref, b2_ref, w3_ref, b3_ref, o_ref, *, n_chunks):
    """Feature-major fused MLP: o = W3 @ relu(W2 @ relu(W1 @ x + b1) + b2) + b3.

    x_ref: (IN_DIM, tb); o_ref: (OUT_DIM, tb); weights (out, in); biases (out, 1) f32.
    The tile is processed in CHUNK-lane slices so h1/h2 never spill to VMEM.
    """

    def chunk_body(c, carry):
        lo = pl.multiple_of(c * CHUNK, CHUNK)
        x = x_ref[:, pl.ds(lo, CHUNK)]
        # fc1 + ReLU (MXU matmul, f32 accumulation regardless of input dtype)
        h1 = jnp.dot(w1_ref[...], x, preferred_element_type=jnp.float32) + b1_ref[...]
        h1 = jnp.maximum(h1, 0.0)
        # fc2 + ReLU (feed the MXU in the weights' native dtype, accumulate f32)
        h2 = jnp.dot(w2_ref[...], h1.astype(w2_ref.dtype),
                     preferred_element_type=jnp.float32) + b2_ref[...]
        h2 = jnp.maximum(h2, 0.0)
        # fc_last (no activation)
        y = jnp.dot(w3_ref[...], h2.astype(w3_ref.dtype),
                    preferred_element_type=jnp.float32) + b3_ref[...]
        o_ref[:, pl.ds(lo, CHUNK)] = y.astype(o_ref.dtype)
        return carry

    lax.fori_loop(0, n_chunks, chunk_body, 0,
                  unroll=True if n_chunks <= 8 else 4)


def _choose_tile(B, tile_b):
    """Single step for small B; otherwise an EVEN step count (v7x megacore balance)."""
    tile_b = max(tile_b, CHUNK)
    if B <= tile_b:
        return _round_up(B, CHUNK)
    n_steps = pl.cdiv(B, tile_b)
    n_steps += n_steps % 2            # even number of steps -> both TensorCores get equal work
    return _round_up(pl.cdiv(B, n_steps), CHUNK)


def cartpole_ff_forward_t(x_t, params, *, tile_b=TILE_B):
    """Feature-major entry point: x_t (6, B) -> (2, B).  Batch rides the lane axis."""
    w1, b1 = params["w1"], params["b1"]
    w2, b2 = params["w2"], params["b2"]
    w3, b3 = params["w3"], params["b3"]
    feat, B = x_t.shape
    out_dim = w3.shape[0]

    tb = _choose_tile(B, tile_b)
    grid = (pl.cdiv(B, tb),)
    n_chunks = tb // CHUNK

    def resident(a):
        # Constant index_map -> VMEM-resident across all grid steps.
        return pl.BlockSpec(a.shape, lambda i: (0, 0))

    flops = 2 * B * (IN_DIM * H1_DIM + H1_DIM * H2_DIM + H2_DIM * OUT_DIM)
    bytes_accessed = int(
        x_t.size * x_t.dtype.itemsize
        + B * out_dim * 4
        + sum(int(p.size) * p.dtype.itemsize for p in (w1, b1, w2, b2, w3, b3))
    )

    kernel = functools.partial(_mlp_kernel, n_chunks=n_chunks)

    return pl.pallas_call(
        kernel,
        out_shape=jax.ShapeDtypeStruct((out_dim, B), jnp.float32),
        grid=grid,
        in_specs=[
            pl.BlockSpec((feat, tb), lambda i: (0, i)),   # x: lane-dense batch tile
            resident(w1), resident(b1),
            resident(w2), resident(b2),
            resident(w3), resident(b3),
        ],
        out_specs=pl.BlockSpec((out_dim, tb), lambda i: (0, i)),
        compiler_params=pltpu.CompilerParams(dimension_semantics=("parallel",)),
        cost_estimate=pl.CostEstimate(flops=int(flops), transcendentals=0,
                                      bytes_accessed=bytes_accessed),
    )(x_t, w1, b1, w2, b2, w3, b3)


def cartpole_ff_forward(x, params, *, tile_b=TILE_B):
    """PyTorch-layout wrapper: x (B, 6) -> (B, 2).

    Throughput callers that already hold x feature-major should call
    cartpole_ff_forward_t directly and skip the two transposes."""
    return cartpole_ff_forward_t(x.T, params, tile_b=tile_b).T


def init_params(key, dtype=jnp.float32):
    """PyTorch-default nn.Linear init.  Weights stored (out, in) — PyTorch's native layout,
    consumed directly by the feature-major kernel.  Biases stored (out, 1) f32 (added after
    f32 accumulation)."""
    dims = [(IN_DIM, H1_DIM), (H1_DIM, H2_DIM), (H2_DIM, OUT_DIM)]
    params = {}
    keys = jax.random.split(key, 2 * len(dims))
    for i, (fan_in, fan_out) in enumerate(dims):
        bound = 1.0 / (fan_in ** 0.5)
        w = jax.random.uniform(keys[2 * i], (fan_out, fan_in), jnp.float32, -bound, bound)
        b = jax.random.uniform(keys[2 * i + 1], (fan_out, 1), jnp.float32, -bound, bound)
        params[f"w{i + 1}"] = w.astype(dtype)
        params[f"b{i + 1}"] = b
    return params


def reference_forward(x, params):
    f32 = lambda a: a.astype(jnp.float32)
    h1 = jnp.maximum(f32(x) @ f32(params["w1"]).T + params["b1"].T, 0.0)
    h2 = jnp.maximum(h1 @ f32(params["w2"]).T + params["b2"].T, 0.0)
    return h2 @ f32(params["w3"]).T + params["b3"].T


if __name__ == "__main__":
    key = jax.random.PRNGKey(0)
    pkey, xkey, xkey2 = jax.random.split(key, 3)

    # 1) Exact f32 semantics, tiny RL-style batch -> single grid step, single chunk.
    params = init_params(pkey, jnp.float32)
    x_small = jax.random.normal(xkey, (8, IN_DIM), jnp.float32)
    out_small = jax.block_until_ready(cartpole_ff_forward(x_small, params))
    ref_small = reference_forward(x_small, params)
    assert out_small.shape == (8, OUT_DIM)
    assert jnp.allclose(out_small, ref_small, atol=1e-5, rtol=1e-5)

    # 2) Multi-step pipelined path (small tile_b to force grid > 1): exercises the even
    #    step split, the in-kernel chunk loop, and the masked partial last tile.
    x_mid = jax.random.normal(xkey2, (2500, IN_DIM), jnp.float32)
    out_mid = jax.block_until_ready(cartpole_ff_forward(x_mid, params, tile_b=1024))
    ref_mid = reference_forward(x_mid, params)
    assert out_mid.shape == (2500, OUT_DIM)
    assert jnp.allclose(out_mid, ref_mid, atol=1e-4, rtol=1e-4)

    # 3) bf16 throughput path (x + weights bf16; accumulation/bias/output stay f32).
    #    Note: activations are rounded to bf16 between layers (MXU-native); the reference
    #    keeps f32 activations, hence the looser tolerance.
    params_bf16 = init_params(pkey, jnp.bfloat16)
    x_bf16 = x_mid.astype(jnp.bfloat16)
    out_bf16 = jax.block_until_ready(cartpole_ff_forward(x_bf16, params_bf16))
    ref_bf16 = reference_forward(x_bf16, params_bf16)
    assert out_bf16.shape == (2500, OUT_DIM)
    assert jnp.allclose(out_bf16, ref_bf16, atol=5e-3, rtol=5e-3)

    print("KERNEL_OK")
</pallas_src>

<mosaic_0001>
module attributes {stable_mosaic.version = 11 : i64} {
  func.func @_mlp_kernel(%arg0: i32, %arg1: memref<6x256xf32, #tpu.memory_space<vmem>>, %arg2: memref<64x6xf32, #tpu.memory_space<vmem>>, %arg3: memref<64x1xf32, #tpu.memory_space<vmem>>, %arg4: memref<64x64xf32, #tpu.memory_space<vmem>>, %arg5: memref<64x1xf32, #tpu.memory_space<vmem>>, %arg6: memref<2x64xf32, #tpu.memory_space<vmem>>, %arg7: memref<2x1xf32, #tpu.memory_space<vmem>>, %arg8: memref<2x256xf32, #tpu.memory_space<vmem>>) attributes {dimension_semantics = [#tpu.dimension_semantics<parallel>], iteration_bounds = array<i64: 1>, scalar_prefetch = 0 : i64, scratch_operands = 0 : i64, tpu.core_type = #tpu.core_type<tc>, window_params = [{transform_indices = @transform_0, window_bounds = array<i64: 6, 256>}, {pipeline_mode = #tpu.pipeline_mode<synchronous>, transform_indices = @transform_1, window_bounds = array<i64: 64, 6>}, {pipeline_mode = #tpu.pipeline_mode<synchronous>, transform_indices = @transform_2, window_bounds = array<i64: 64, 1>}, {pipeline_mode = #tpu.pipeline_mode<synchronous>, transform_indices = @transform_3, window_bounds = array<i64: 64, 64>}, {pipeline_mode = #tpu.pipeline_mode<synchronous>, transform_indices = @transform_4, window_bounds = array<i64: 64, 1>}, {pipeline_mode = #tpu.pipeline_mode<synchronous>, transform_indices = @transform_5, window_bounds = array<i64: 2, 64>}, {pipeline_mode = #tpu.pipeline_mode<synchronous>, transform_indices = @transform_6, window_bounds = array<i64: 2, 1>}, {transform_indices = @transform_7, window_bounds = array<i64: 2, 256>}]} {
    %c0_i32 = arith.constant 0 : i32
    %c256_i32 = arith.constant 256 : i32
    %0 = arith.muli %c0_i32, %c256_i32 : i32
    %1 = tpu.assume_multiple %0, 256 : i32
    %c0 = arith.constant 0 : index
    %2 = arith.index_cast %1 : i32 to index
    %3 = vector.load %arg1[%c0, %2] : memref<6x256xf32, #tpu.memory_space<vmem>>, vector<6x256xf32>
    %c0_0 = arith.constant 0 : index
    %c0_1 = arith.constant 0 : index
    %4 = vector.load %arg2[%c0_0, %c0_1] : memref<64x6xf32, #tpu.memory_space<vmem>>, vector<64x6xf32>
    %cst = arith.constant dense<0.000000e+00> : vector<64x256xf32>
    %5 = tpu.matmul %4, %3, %cst {dimension_numbers = #tpu.dot_dimension_numbers<[1], [0], [0], [1], [0, 0, 1, 1], [], []>} : vector<64x6xf32>, vector<6x256xf32>, vector<64x256xf32> -> vector<64x256xf32>
    %c0_2 = arith.constant 0 : index
    %c0_3 = arith.constant 0 : index
    %6 = vector.load %arg3[%c0_2, %c0_3] : memref<64x1xf32, #tpu.memory_space<vmem>>, vector<64x1xf32>
    %7 = vector.broadcast %6 : vector<64x1xf32> to vector<64x256xf32>
    %8 = arith.addf %5, %7 : vector<64x256xf32>
    %cst_4 = arith.constant 0.000000e+00 : f32
    %9 = vector.broadcast %cst_4 : f32 to vector<64x256xf32>
    %10 = arith.maximumf %8, %9 : vector<64x256xf32>
    %c0_5 = arith.constant 0 : index
    %c0_6 = arith.constant 0 : index
    %11 = vector.load %arg4[%c0_5, %c0_6] : memref<64x64xf32, #tpu.memory_space<vmem>>, vector<64x64xf32>
    %cst_7 = arith.constant dense<0.000000e+00> : vector<64x256xf32>
    %12 = tpu.matmul %11, %10, %cst_7 {dimension_numbers = #tpu.dot_dimension_numbers<[1], [0], [0], [1], [0, 0, 1, 1], [], []>} : vector<64x64xf32>, vector<64x256xf32>, vector<64x256xf32> -> vector<64x256xf32>
    %c0_8 = arith.constant 0 : index
    %c0_9 = arith.constant 0 : index
    %13 = vector.load %arg5[%c0_8, %c0_9] : memref<64x1xf32, #tpu.memory_space<vmem>>, vector<64x1xf32>
    %14 = vector.broadcast %13 : vector<64x1xf32> to vector<64x256xf32>
    %15 = arith.addf %12, %14 : vector<64x256xf32>
    %cst_10 = arith.constant 0.000000e+00 : f32
    %16 = vector.broadcast %cst_10 : f32 to vector<64x256xf32>
    %17 = arith.maximumf %15, %16 : vector<64x256xf32>
    %c0_11 = arith.constant 0 : index
    %c0_12 = arith.constant 0 : index
    %18 = vector.load %arg6[%c0_11, %c0_12] : memref<2x64xf32, #tpu.memory_space<vmem>>, vector<2x64xf32>
    %cst_13 = arith.constant dense<0.000000e+00> : vector<2x256xf32>
    %19 = tpu.matmul %18, %17, %cst_13 {dimension_numbers = #tpu.dot_dimension_numbers<[1], [0], [0], [1], [0, 0, 1, 1], [], []>} : vector<2x64xf32>, vector<64x256xf32>, vector<2x256xf32> -> vector<2x256xf32>
    %c0_14 = arith.constant 0 : index
    %c0_15 = arith.constant 0 : index
    %20 = vector.load %arg7[%c0_14, %c0_15] : memref<2x1xf32, #tpu.memory_space<vmem>>, vector<2x1xf32>
    %21 = vector.broadcast %20 : vector<2x1xf32> to vector<2x256xf32>
    %22 = arith.addf %19, %21 : vector<2x256xf32>
    %c0_16 = arith.constant 0 : index
    %23 = arith.index_cast %1 : i32 to index
    %24 = vector.load %arg8[%c0_16, %23] : memref<2x256xf32, #tpu.memory_space<vmem>>, vector<2x256xf32>
    tpu.vector_store %arg8[%c0_16, %23], %22 {strides = array<i32>} : memref<2x256xf32, #tpu.memory_space<vmem>>, vector<2x256xf32>,
    %c1_i32 = arith.constant 1 : i32
    return
  }
  func.func @transform_0(%arg0: i32) -> (i32, i32) {
    %c0_i32 = arith.constant 0 : i32
    %c0_i32_0 = arith.constant 0 : i32
    return %c0_i32, %arg0 : i32, i32
  }
  func.func @transform_1(%arg0: i32) -> (i32, i32) {
    %c0_i32 = arith.constant 0 : i32
    %c0_i32_0 = arith.constant 0 : i32
    %c0_i32_1 = arith.constant 0 : i32
    return %c0_i32, %c0_i32_0 : i32, i32
  }
  func.func @transform_2(%arg0: i32) -> (i32, i32) {
    %c0_i32 = arith.constant 0 : i32
    %c0_i32_0 = arith.constant 0 : i32
    %c0_i32_1 = arith.constant 0 : i32
    return %c0_i32, %c0_i32_0 : i32, i32
  }
  func.func @transform_3(%arg0: i32) -> (i32, i32) {
    %c0_i32 = arith.constant 0 : i32
    %c0_i32_0 = arith.constant 0 : i32
    %c0_i32_1 = arith.constant 0 : i32
    return %c0_i32, %c0_i32_0 : i32, i32
  }
  func.func @transform_4(%arg0: i32) -> (i32, i32) {
    %c0_i32 = arith.constant 0 : i32
    %c0_i32_0 = arith.constant 0 : i32
    %c0_i32_1 = arith.constant 0 : i32
    return %c0_i32, %c0_i32_0 : i32, i32
  }
  func.func @transform_5(%arg0: i32) -> (i32, i32) {
    %c0_i32 = arith.constant 0 : i32
    %c0_i32_0 = arith.constant 0 : i32
    %c0_i32_1 = arith.constant 0 : i32
    return %c0_i32, %c0_i32_0 : i32, i32
  }
  func.func @transform_6(%arg0: i32) -> (i32, i32) {
    %c0_i32 = arith.constant 0 : i32
    %c0_i32_0 = arith.constant 0 : i32
    %c0_i32_1 = arith.constant 0 : i32
    return %c0_i32, %c0_i32_0 : i32, i32
  }
  func.func @transform_7(%arg0: i32) -> (i32, i32) {
    %c0_i32 = arith.constant 0 : i32
    %c0_i32_0 = arith.constant 0 : i32
    return %c0_i32, %arg0 : i32, i32
  }
}

</mosaic_0001>

<bundles_post_ra>
// kernel: tpu_custom_call.1
= control target key start
LH: loop header
LB: loop body
LE: loop exit
PB: predicated region body
PF: predicated region fallthrough
CT: control target
= control target key end

     0   :  { %12 = vsyncpa [#allocation3], 0  ;;  %vm110_vm0 = vcmask 1045504   ;;  %v610_v2 = vmov 0.0   ;;  %vm85_vm1 = vcmask 48128   ;;  %v611_v4 = vmov 0   ;;  %s798_s0 = inlined_call_operand.vmem [shape: f32[6,8], index: 0, kind: input, shape index: {}]   ;;  %s799_s1 = inlined_call_operand.vmem [shape: f32[64,6], index: 1, kind: input, shape index: {}]   ;;  %s800_s2 = inlined_call_operand.vmem [shape: f32[64,1], index: 2, kind: input, shape index: {}]   ;;  %s801_s3 = inlined_call_operand.vmem [shape: f32[64,64], index: 3, kind: input, shape index: {}]   ;;  %s802_s4 = inlined_call_operand.vmem [shape: f32[64,1], index: 4, kind: input, shape index: {}]   ;;  %s803_s5 = inlined_call_operand.vmem [shape: f32[2,64], index: 5, kind: input, shape index: {}]   ;;  %s804_s6 = inlined_call_operand.vmem [shape: f32[2,1], index: 6, kind: input, shape index: {}]   ;;  %s805_s7 = inlined_call_operand.hbm [shape: f32[2,8], index: 7, kind: output, shape index: {}]  }
   0x1   :  { %v28_v0 = vld [vmem:[%s798_s0 + $0x8] sm:$0x3f]  ;;  %v27_v1 = vld [vmem:[%s798_s0] sm:$0x3f]  ;;  %181 = vmatprep.mubr.f32.mxu0 %v610_v2  ;;  %587 = vset.pattern.permute.xlu1 %v611_v4  ;;  %v44_v7 = vld [vmem:[%s800_s2 + $0x38] sm:$0xff]  ;;  %vm302_vm2 = vcmask 523264  }
   0x2   :  { %563 = vmatprep.subr.msk.mxu0 %vm110_vm0, %v28_v0  ;;  %v29_v3 = vld [vmem:[%s799_s1] sm:$0xff]  ;;  %586 = vset.pattern.permute.xlu0 %v611_v4  ;;  %v30_v5 = vld [vmem:[%s799_s1 + $0x8] sm:$0xff]  ;;  %v43_v9 = vld [vmem:[%s800_s2 + $0x30] sm:$0xff] }
   0x3   :  { %564 = vmatpush1.msk.msra.mxu0 %vm110_vm0, %v27_v1  ;;  %v42_v6 = vld [vmem:[%s800_s2 + $0x28] sm:$0xff]  ;;  %391 = vmatprep.mubr.f32.mxu1 %v610_v2  ;;  %v41_v8 = vld [vmem:[%s800_s2 + $0x20] sm:$0xff]  ;;  %v31_v10 = vld [vmem:[%s799_s1 + $0x10] sm:$0xff] }
   0x4   :  { %565 = vmatmul.mubr.msk.f32.vlgmr.msra.gmra.mxu0 %vm85_vm1, %v29_v3  ;;  %72 = vperm.xlu1 %587, %v42_v6   ;;  %v39_v11 = vld [vmem:[%s800_s2 + $0x10] sm:$0xff]  ;;  %v40_v12 = vld [vmem:[%s800_s2 + $0x18] sm:$0xff]  ;;  %v37_v14 = vld [vmem:[%s800_s2] sm:$0xff] }
   0x5   :  { %187 = vmatprep.mubr.f32.mxu0 %v610_v2  ;;  %82 = vperm.xlu0 %586, %v44_v7   ;;  %v32_v13 = vld [vmem:[%s799_s1 + $0x18] sm:$0xff]  ;;  %v38_v15 = vld [vmem:[%s800_s2 + $0x8] sm:$0xff]  ;;  %v33_v16 = vld [vmem:[%s799_s1 + $0x20] sm:$0xff] }
   0x6   :  { %v261_v17 = vld [vmem:[%s802_s4 + $0x38] sm:$0xff]  ;;  %v260_v18 = vld [vmem:[%s802_s4 + $0x30] sm:$0xff]  ;;  %v34_v19 = vld [vmem:[%s799_s1 + $0x28] sm:$0xff] }
   0x7   :  { %v259_v20 = vld [vmem:[%s802_s4 + $0x28] sm:$0xff]  ;;  %v258_v21 = vld [vmem:[%s802_s4 + $0x20] sm:$0xff]  ;;  %v35_v22 = vld [vmem:[%s799_s1 + $0x30] sm:$0xff] }
   0x8   :  { %566 = vmatmul.mubr.msk.f32.gmra.mxu0 %vm85_vm1, %v30_v5  ;;  %67 = vperm.xlu1 %587, %v41_v8   ;;  %v257_v23 = vld [vmem:[%s802_s4 + $0x18] sm:$0xff]  ;;  %v256_v24 = vld [vmem:[%s802_s4 + $0x10] sm:$0xff]  ;;  %v255_v26 = vld [vmem:[%s802_s4 + $0x8] sm:$0xff] }
   0x9   :  { %193 = vmatprep.mubr.f32.mxu0 %v610_v2  ;;  %77 = vperm.xlu0 %586, %v43_v9   ;;  %v36_v25 = vld [vmem:[%s799_s1 + $0x38] sm:$0xff]  ;;  %v254_v27 = vld [vmem:[%s802_s4] sm:$0xff] }
   0xa   :  { %v457_v28 = vld [vmem:[%s804_s6] sm:$0x3] }
   0xc   :  { %567 = vmatmul.mubr.msk.f32.gmra.mxu0 %vm85_vm1, %v31_v10  ;;  %57 = vperm.xlu1 %587, %v39_v11  }
   0xd   :  { %199 = vmatprep.mubr.f32.mxu0 %v610_v2  ;;  %62 = vperm.xlu0 %586, %v40_v12  }
  0x10   :  { %568 = vmatmul.mubr.msk.f32.gmra.mxu0 %vm85_vm1, %v32_v13  ;;  %47 = vperm.xlu1 %587, %v37_v14  }
  0x11   :  { %205 = vmatprep.mubr.f32.mxu0 %v610_v2  ;;  %52 = vperm.xlu0 %586, %v38_v15  }
  0x14   :  { %569 = vmatmul.mubr.msk.f32.gmra.mxu0 %vm85_vm1, %v33_v16  ;;  %294 = vperm.xlu1 %587, %v260_v18  }
  0x15   :  { %211 = vmatprep.mubr.f32.mxu0 %v610_v2  ;;  %299 = vperm.xlu0 %586, %v261_v17  }
  0x18   :  { %570 = vmatmul.mubr.msk.f32.gmra.mxu0 %vm85_vm1, %v34_v19  ;;  %284 = vperm.xlu1 %587, %v258_v21  }
  0x19   :  { %217 = vmatprep.mubr.f32.mxu0 %v610_v2  ;;  %289 = vperm.xlu0 %586, %v259_v20  }
  0x1c   :  { %571 = vmatmul.mubr.msk.f32.gmra.mxu0 %vm85_vm1, %v35_v22  ;;  %274 = vperm.xlu1 %587, %v256_v24   ;;  %v246_v22 = vld [vmem:[%s801_s3] sm:$0xff]  ;;  %v248_v24 = vld [vmem:[%s801_s3 + $0x10] sm:$0xff] }
  0x1d   :  { %223 = vmatprep.mubr.f32.mxu0 %v610_v2  ;;  %279 = vperm.xlu0 %586, %v257_v23   ;;  %v247_v23 = vld [vmem:[%s801_s3 + $0x8] sm:$0xff] }
  0x20   :  { %572 = vmatmul.mubr.msk.f32.gmra.mxu0 %vm85_vm1, %v36_v25  ;;  %264 = vperm.xlu1 %587, %v254_v27   ;;  %v249_v25 = vld [vmem:[%s801_s3 + $0x18] sm:$0xff]  ;;  %v251_v27 = vld [vmem:[%s801_s3 + $0x28] sm:$0xff] }
  0x21   :  { %530 = vmatprep.mubr.f32.mxu0 %v610_v2  ;;  %269 = vperm.xlu0 %586, %v255_v26   ;;  %v250_v26 = vld [vmem:[%s801_s3 + $0x20] sm:$0xff] }
  0x25   :  { %460 = vperm.xlu0 %586, %v457_v28   ;;  %v252_v28 = vld [vmem:[%s801_s3 + $0x30] sm:$0xff] }
  0x7f   :  { %v73_v42 = vpop.permute.xlu1 %72 }
  0x80   :  { %v83_v40 = vpop.permute.xlu0 %82 }
  0x83   :  { %v68_v47 = vpop.permute.xlu1 %67 }
  0x84   :  { %v78_v45 = vpop.permute.xlu0 %77 }
  0x87   :  { %v58_v58 = vpop.permute.xlu1 %57 }
  0x88   :  { %v63_v53 = vpop.permute.xlu0 %62 }
  0x8b   :  { %v48_v9 = vpop.permute.xlu1 %47 }
  0x8c   :  { %v53_v4 = vpop.permute.xlu0 %52 }
  0xc4   :  { %v183_v29 = vpop.f32.mrf.mxu0 }
  0xc5   :  { %v184_v16 = vadd.f32 %v183_v29, %v48_v9  ;;  %v253_v29 = vld [vmem:[%s801_s3 + $0x38] sm:$0xff] }
  0xc6   :  { %v185_v30 = vpop.f32.mrf.mxu0 }
  0xc7   :  { %v186_v14 = vadd.f32 %v185_v30, %v48_v9  ;;  %v230_v21 = vmax.f32 %v184_v16, 0.0 }
  0xc8   :  { %v189_v31 = vpop.f32.mrf.mxu0 }
  0xc9   :  { %v190_v12 = vadd.f32 %v189_v31, %v53_v4  ;;  %v231_v20 = vmax.f32 %v186_v14, 0.0 }
  0xca   :  { %v191_v32 = vpop.f32.mrf.mxu0 }
  0xcb   :  { %v192_v10 = vadd.f32 %v191_v32, %v53_v4  ;;  %v232_v19 = vmax.f32 %v190_v12, 0.0 }
  0xcc   :  { %v195_v33 = vpop.f32.mrf.mxu0 }
  0xcd   :  { %v196_v7 = vadd.f32 %v195_v33, %v58_v58  ;;  %v233_v18 = vmax.f32 %v192_v10, 0.0 }
  0xce   :  { %v197_v34 = vpop.f32.mrf.mxu0 }
  0xcf   :  { %v198_v5 = vadd.f32 %v197_v34, %v58_v58  ;;  %v234_v17 = vmax.f32 %v196_v7, 0.0 }
  0xd0   :  { %v201_v35 = vpop.f32.mrf.mxu0 }
  0xd1   :  { %v202_v1 = vadd.f32 %v201_v35, %v63_v53  ;;  %v235_v15 = vmax.f32 %v198_v5, 0.0 }
  0xd2   :  { %v203_v36 = vpop.f32.mrf.mxu0 }
  0xd3   :  { %v204_v63 = vadd.f32 %v203_v36, %v63_v53  ;;  %v236_v13 = vmax.f32 %v202_v1, 0.0 }
  0xd4   :  { %v207_v37 = vpop.f32.mrf.mxu0 }
  0xd5   :  { %v208_v61 = vadd.f32 %v207_v37, %v68_v47  ;;  %v237_v11 = vmax.f32 %v204_v63, 0.0 }
  0xd6   :  { %v209_v38 = vpop.f32.mrf.mxu0 }
  0xd7   :  { %v210_v59 = vadd.f32 %v209_v38, %v68_v47  ;;  %v238_v8 = vmax.f32 %v208_v61, 0.0 }
  0xd8   :  { %v213_v39 = vpop.f32.mrf.mxu0 }
  0xd9   :  { %v214_v56 = vadd.f32 %v213_v39, %v73_v42  ;;  %v239_v6 = vmax.f32 %v210_v59, 0.0 }
  0xda   :  { %v215_v41 = vpop.f32.mrf.mxu0 }
  0xdb   :  { %v216_v54 = vadd.f32 %v215_v41, %v73_v42  ;;  %v240_v3 = vmax.f32 %v214_v56, 0.0  ;;  %v300_v41 = vpop.permute.xlu0 %299 }
  0xdc   :  { %v219_v43 = vpop.f32.mrf.mxu0 }
  0xdd   :  { %v220_v52 = vadd.f32 %v219_v43, %v78_v45  ;;  %v241_v0 = vmax.f32 %v216_v54, 0.0 }
  0xde   :  { %v221_v44 = vpop.f32.mrf.mxu0 }
  0xdf   :  { %v222_v50 = vadd.f32 %v221_v44, %v78_v45  ;;  %v242_v62 = vmax.f32 %v220_v52, 0.0  ;;  %v290_v45 = vpop.permute.xlu0 %289 }
  0xe0   :  { %v225_v46 = vpop.f32.mrf.mxu0 }
  0xe1   :  { %v226_v48 = vadd.f32 %v225_v46, %v83_v40  ;;  %v243_v60 = vmax.f32 %v222_v50, 0.0 }
  0xe2   :  { %v227_v49 = vpop.f32.mrf.mxu0 }
  0xe3   :  { %v228_v51 = vadd.f32 %v227_v49, %v83_v40  ;;  %v244_v57 = vmax.f32 %v226_v48, 0.0 }
  0xe5   :  { %v245_v55 = vmax.f32 %v228_v51, 0.0 }
  0xe7   :  { %343 = vmatprep.subr.mxu1 %v245_v55  ;;  %v280_v55 = vpop.permute.xlu0 %279 }
  0xe8   :  { %344 = vmatpush1.msra.mxu1 %v244_v57 }
  0xe9   :  { %345 = vmatprep.subr.mxu1 %v243_v60 }
  0xea   :  { %346 = vmatpush1.msra.mxu1 %v242_v62 }
  0xeb   :  { %347 = vmatprep.subr.mxu1 %v241_v0 }
  0xec   :  { %348 = vmatpush1.msra.mxu1 %v240_v3 }
  0xed   :  { %349 = vmatprep.subr.mxu1 %v239_v6  ;;  %v270_v6 = vpop.permute.xlu0 %269 }
  0xee   :  { %350 = vmatpush1.msra.mxu1 %v238_v8 }
  0xef   :  { %351 = vmatprep.subr.mxu1 %v237_v11 }
  0xf0   :  { %352 = vmatpush1.msra.mxu1 %v236_v13 }
  0xf1   :  { %353 = vmatprep.subr.mxu1 %v235_v15 }
  0xf2   :  { %354 = vmatpush1.msra.mxu1 %v234_v17 }
  0xf3   :  { %355 = vmatprep.subr.mxu1 %v233_v18 }
  0xf4   :  { %356 = vmatpush1.msra.mxu1 %v232_v19 }
  0xf5   :  { %357 = vmatprep.subr.mxu1 %v231_v20 }
  0xf6   :  { %358 = vmatpush1.msra.mxu1 %v230_v21 }
  0xf7   :  { %573 = vmatmul.mubr.msk.f32.vlgmr.msra.gmra.mxu1 %vm302_vm2, %v246_v22  ;;  %v456_v22 = vld [vmem:[%s803_s5] sm:$0x3] }
  0xf8   :  { %397 = vmatprep.mubr.f32.mxu1 %v610_v2 }
  0xfb   :  { %574 = vmatmul.mubr.msk.f32.gmra.mxu1 %vm302_vm2, %v247_v23 }
  0xfc   :  { %403 = vmatprep.mubr.f32.mxu1 %v610_v2 }
  0xff   :  { %575 = vmatmul.mubr.msk.f32.gmra.mxu1 %vm302_vm2, %v248_v24  ;;  %v461_v24 = vpop.permute.xlu0 %460 }
 0x100   :  { %409 = vmatprep.mubr.f32.mxu1 %v610_v2 }
 0x103   :  { %576 = vmatmul.mubr.msk.f32.gmra.mxu1 %vm302_vm2, %v249_v25 }
 0x104   :  { %415 = vmatprep.mubr.f32.mxu1 %v610_v2 }
 0x107   :  { %577 = vmatmul.mubr.msk.f32.gmra.mxu1 %vm302_vm2, %v250_v26 }
 0x108   :  { %421 = vmatprep.mubr.f32.mxu1 %v610_v2 }
 0x10b   :  { %578 = vmatmul.mubr.msk.f32.gmra.mxu1 %vm302_vm2, %v251_v27 }
 0x10c   :  { %427 = vmatprep.mubr.f32.mxu1 %v610_v2 }
 0x10f   :  { %579 = vmatmul.mubr.msk.f32.gmra.mxu1 %vm302_vm2, %v252_v28 }
 0x110   :  { %433 = vmatprep.mubr.f32.mxu1 %v610_v2  ;;  %v295_v2 = vpop.permute.xlu1 %294 }
 0x113   :  { %580 = vmatmul.mubr.msk.f32.gmra.mxu1 %vm302_vm2, %v253_v29 }
 0x114   :  { %v285_v47 = vpop.permute.xlu1 %284 }
 0x118   :  { %v275_v60 = vpop.permute.xlu1 %274 }
 0x11c   :  { %v265_v11 = vpop.permute.xlu1 %264 }
 0x1b7   :  { %v393_v30 = vpop.f32.mrf.mxu1 }
 0x1b8   :  { %v394_v16 = vadd.f32 %v393_v30, %v265_v11 }
 0x1b9   :  { %v395_v31 = vpop.f32.mrf.mxu1 }
 0x1ba   :  { %v396_v14 = vadd.f32 %v395_v31, %v265_v11  ;;  %v440_v21 = vmax.f32 %v394_v16, 0.0 }
 0x1bb   :  { %v399_v32 = vpop.f32.mrf.mxu1 }
 0x1bc   :  { %v400_v12 = vadd.f32 %v399_v32, %v270_v6  ;;  %v441_v20 = vmax.f32 %v396_v14, 0.0 }
 0x1bd   :  { %v401_v33 = vpop.f32.mrf.mxu1 }
 0x1be   :  { %v402_v9 = vadd.f32 %v401_v33, %v270_v6  ;;  %v442_v19 = vmax.f32 %v400_v12, 0.0 }
 0x1bf   :  { %v405_v34 = vpop.f32.mrf.mxu1 }
 0x1c0   :  { %v406_v7 = vadd.f32 %v405_v34, %v275_v60  ;;  %v443_v18 = vmax.f32 %v402_v9, 0.0 }
 0x1c1   :  { %v407_v35 = vpop.f32.mrf.mxu1 }
 0x1c2   :  { %v408_v4 = vadd.f32 %v407_v35, %v275_v60  ;;  %v444_v17 = vmax.f32 %v406_v7, 0.0 }
 0x1c3   :  { %v411_v36 = vpop.f32.mrf.mxu1 }
 0x1c4   :  { %v412_v1 = vadd.f32 %v411_v36, %v280_v55  ;;  %v445_v15 = vmax.f32 %v408_v4, 0.0 }
 0x1c5   :  { %v413_v37 = vpop.f32.mrf.mxu1 }
 0x1c6   :  { %v414_v63 = vadd.f32 %v413_v37, %v280_v55  ;;  %v446_v13 = vmax.f32 %v412_v1, 0.0 }
 0x1c7   :  { %v417_v38 = vpop.f32.mrf.mxu1 }
 0x1c8   :  { %v418_v61 = vadd.f32 %v417_v38, %v285_v47  ;;  %v447_v10 = vmax.f32 %v414_v63, 0.0 }
 0x1c9   :  { %v419_v39 = vpop.f32.mrf.mxu1 }
 0x1ca   :  { %v420_v58 = vadd.f32 %v419_v39, %v285_v47  ;;  %v448_v8 = vmax.f32 %v418_v61, 0.0 }
 0x1cb   :  { %v423_v40 = vpop.f32.mrf.mxu1 }
 0x1cc   :  { %v424_v56 = vadd.f32 %v423_v40, %v290_v45  ;;  %v449_v5 = vmax.f32 %v420_v58, 0.0 }
 0x1cd   :  { %v425_v42 = vpop.f32.mrf.mxu1 }
 0x1ce   :  { %v426_v53 = vadd.f32 %v425_v42, %v290_v45  ;;  %v450_v3 = vmax.f32 %v424_v56, 0.0 }
 0x1cf   :  { %v429_v43 = vpop.f32.mrf.mxu1 }
 0x1d0   :  { %v430_v52 = vadd.f32 %v429_v43, %v295_v2  ;;  %v451_v0 = vmax.f32 %v426_v53, 0.0 }
 0x1d1   :  { %v431_v44 = vpop.f32.mrf.mxu1 }
 0x1d2   :  { %v432_v50 = vadd.f32 %v431_v44, %v295_v2  ;;  %v452_v62 = vmax.f32 %v430_v52, 0.0 }
 0x1d3   :  { %v435_v46 = vpop.f32.mrf.mxu1 }
 0x1d4   :  { %v436_v48 = vadd.f32 %v435_v46, %v300_v41  ;;  %v453_v59 = vmax.f32 %v432_v50, 0.0 }
 0x1d5   :  { %v437_v49 = vpop.f32.mrf.mxu1 }
 0x1d6   :  { %v438_v51 = vadd.f32 %v437_v49, %v300_v41  ;;  %v454_v57 = vmax.f32 %v436_v48, 0.0 }
 0x1d8   :  { %v455_v54 = vmax.f32 %v438_v51, 0.0 }
 0x1da   :  { %482 = vmatprep.subr.mxu0 %v455_v54 }
 0x1db   :  { %483 = vmatpush1.msra.mxu0 %v454_v57 }
 0x1dc   :  { %484 = vmatprep.subr.mxu0 %v453_v59 }
 0x1dd   :  { %485 = vmatpush1.msra.mxu0 %v452_v62 }
 0x1de   :  { %486 = vmatprep.subr.mxu0 %v451_v0 }
 0x1df   :  { %487 = vmatpush1.msra.mxu0 %v450_v3 }
 0x1e0   :  { %488 = vmatprep.subr.mxu0 %v449_v5 }
 0x1e1   :  { %489 = vmatpush1.msra.mxu0 %v448_v8 }
 0x1e2   :  { %490 = vmatprep.subr.mxu0 %v447_v10 }
 0x1e3   :  { %491 = vmatpush1.msra.mxu0 %v446_v13 }
 0x1e4   :  { %492 = vmatprep.subr.mxu0 %v445_v15 }
 0x1e5   :  { %493 = vmatpush1.msra.mxu0 %v444_v17 }
 0x1e6   :  { %494 = vmatprep.subr.mxu0 %v443_v18 }
 0x1e7   :  { %495 = vmatpush1.msra.mxu0 %v442_v19 }
 0x1e8   :  { %496 = vmatprep.subr.mxu0 %v441_v20 }
 0x1e9   :  { %497 = vmatpush1.msra.mxu0 %v440_v21 }
 0x1ea   :  { %581 = vmatmul.mubr.msk.f32.vlgmr.msra.gmra.mxu0 %vm302_vm2, %v456_v22 }
 0x2aa   :  { %v532_v23 = vpop.f32.mrf.mxu0 }
 0x2ab   :  { %v533_v26 = vadd.f32 %v532_v23, %v461_v24 }
 0x2ac   :  { %v534_v25 = vpop.f32.mrf.mxu0 }
 0x2ad   :  { %v535_v27 = vadd.f32 %v534_v25, %v461_v24 }
 0x2af   :  { %v539_v28 = vcombine.low %v533_v26, %v535_v27 }
 0x2b1   :  { %582 = vst.sshfl [vmem:[#allocation2] sm:$0x33 pattern:$0x76325410] %v539_v28 }
 0x2b2   :  { %553 = vsyncadd [#allocation3], 32  ;;  %s612_s18 = smov [#allocation2]  }
 0x2b3   :  { %s555_s19 = sshll.u32 %s612_s18, 4  ;;  %s556_s19 = int_to_ptr.vmem [resolvable:$true] %s555_s19 }
 0x2b4   :  { %s588_s20 = scalar_lea.vmem %s556_s19, 32  ;;  %s592_s21 = scalar_lea.vmem %s556_s19, 64 }
 0x2b5   :  { %p589_p0 = scmp.ne.s32.totalorder %s556_s19, %s588_s20  ;;  %p593_p1 = scmp.lt.s32.totalorder %s556_s19, %s556_s19 }
 0x2b6   :  { %p594_p2 = scmp.lt.s32.totalorder %s592_s21, %s588_s20 }
 0x2b8   :  { %p595_p3 = por %p594_p2, %p593_p1 }
 0x2ba   :  { %p596_p4 = pnand %p595_p3, %p589_p0 }
 0x2bc   :  { %599 = shalt.err (!%p596_p4)
}
 0x2bd   :  { %558 = dma.vmem_to_hbm [thread:$0]  %s556_s19, 32, %s805_s7, [#allocation3]  }
 0x2be   :  { %608 = dma.done.wait [#allocation3], 64  }
 0x2bf   :  { %609 = vsyncadd [#allocation3], 4294967232 }
 0x2c0   :  { %562 = vsyncpa [#allocation3], 1 }

</bundles_post_ra>
